<compile_context>
chip_gen: v6e
topology: v6e:2x2x1
jax: 0.10.0
libtpu: 0.0.40
codegen_flags: <defaults>
</compile_context>

<pallas_src>
import jax
import jax.numpy as jnp
from jax.experimental import pallas as pl
from jax.experimental.pallas import tpu as pltpu


def _round_up(x, m):
    return ((x + m - 1) // m) * m


# ----------------------------- Pallas kernel ------------------------------- #

def _ssff_kernel(x_ref, w1_ref, w3_ref, b3_ref, out_ref):
    # x_ref : (1, C_pad, T)        bf16  [p3|p4|p5|ones|0-pad] channel rows
    # w1_ref: (3*channel, C_pad)   bf16  block-diag folded Conv+BN2d weights,
    #                                    BN2d bias folded into the ones-row column
    # w3_ref: (3*channel, 3*channel) bf16 block-diag folded Conv3d*BN3d weights
    # b3_ref: (3*channel, 1)       f32   folded Conv3d+BN3d bias
    # out_ref:(1, channel, T)      bf16/f32
    x = x_ref[0]

    # Stage 1: three 1x1 Conv2d + BN2d (bias via constant-1 row) in one GEMM.
    y = jnp.dot(w1_ref[...], x, preferred_element_type=jnp.float32)
    # SiLU with a single EUP op: x*sigmoid(x) == 0.5*x*(1 + tanh(x/2)).
    y = 0.5 * y * (1.0 + jnp.tanh(0.5 * y))

    # Stage 2: shared 1x1x1 Conv3d + BN3d + LeakyReLU(0.1) in one GEMM.
    z = jnp.dot(w3_ref[...], y.astype(w3_ref.dtype),
                preferred_element_type=jnp.float32)
    z = z + b3_ref[...]
    z = jnp.maximum(z, 0.1 * z)

    # MaxPool3d(kernel_size=(3,1,1)) over the depth-of-3 stack.
    c = out_ref.shape[1]
    out = jnp.maximum(jnp.maximum(z[0:c, :], z[c:2 * c, :]), z[2 * c:3 * c, :])
    out_ref[0] = out.astype(out_ref.dtype)


def ssff_pallas(x, w1, w3, b3, channel, *, tile_lanes=2048,
                out_dtype=jnp.bfloat16):
    """x: (N, C_pad, HW) bf16. Returns (N, channel, HW) in out_dtype."""
    n, c_pad, hw = x.shape
    tile = min(tile_lanes, _round_up(hw, 128))
    # Megacore (v7x): make sure the parallel grid has >= 2 steps when possible.
    if n * pl.cdiv(hw, tile) < 2:
        tile = max(128, _round_up(pl.cdiv(hw, 2), 128))
    grid = (n, pl.cdiv(hw, tile))   # ragged last block OK (columns independent)

    return pl.pallas_call(
        _ssff_kernel,
        out_shape=jax.ShapeDtypeStruct((n, channel, hw), out_dtype),
        grid_spec=pltpu.PrefetchScalarGridSpec(
            num_scalar_prefetch=0,
            grid=grid,
            in_specs=[
                pl.BlockSpec((1, c_pad, tile), lambda i, j: (i, 0, j)),
                pl.BlockSpec(w1.shape, lambda i, j: (0, 0)),
                pl.BlockSpec(w3.shape, lambda i, j: (0, 0)),
                pl.BlockSpec(b3.shape, lambda i, j: (0, 0)),
            ],
            out_specs=pl.BlockSpec((1, channel, tile), lambda i, j: (i, 0, j)),
        ),
        compiler_params=pltpu.CompilerParams(
            dimension_semantics=("parallel", "parallel")),
    )(x, w1, w3, b3)


# ------------------------------ JAX glue ----------------------------------- #

def _nearest_resize_nchw(p, H, W):
    """F.interpolate(mode='nearest'): src = floor(dst * in / out)."""
    _, _, h, w = p.shape
    if (h, w) == (H, W):
        return p
    hi = (jnp.arange(H) * h) // H
    wi = (jnp.arange(W) * w) // W
    return p[:, :, hi][:, :, :, wi]


def fold_params(params, inc, channel, c_pad):
    """Fold BN scales into weights; build block-diagonal GEMM operands.

    W1 gets an extra column (at index sum(inc)) holding the folded BN2d bias,
    matched by the constant-1 input row, so stage 1 needs no explicit bias add.
    """
    (w0, s0, b0, w1, s1, b1, w2, s2, b2, w3, b3c, s3, bb3) = params
    ws, ss, bs = [w0, w1, w2], [s0, s1, s2], [b0, b1, b2]

    c_cat = sum(inc)
    W1 = jnp.zeros((3 * channel, c_pad), jnp.float32)
    off = 0
    for i, c_in in enumerate(inc):
        blk = ss[i][:, None] * ws[i].T                    # (channel, c_in)
        W1 = W1.at[i * channel:(i + 1) * channel, off:off + c_in].set(blk)
        off += c_in
    W1 = W1.at[:, c_cat].set(jnp.concatenate(bs))         # bias column (ones row)

    w3t = s3[:, None] * w3.T                              # (channel, channel)
    W3 = jnp.kron(jnp.eye(3, dtype=jnp.float32), w3t)     # block-diag x3
    B3 = jnp.tile(s3 * b3c + bb3, 3)[:, None]             # (3*channel, 1)

    return (W1.astype(jnp.bfloat16), W3.astype(jnp.bfloat16),
            B3.astype(jnp.float32))


def prepare_inputs(xs, params, inc, channel):
    """Build the NCHW channel-stacked lane matrix and folded weights."""
    p3, p4, p5 = xs
    N, _, H3, W3 = p3.shape
    HW = H3 * W3
    c_cat = sum(inc)
    c_pad = _round_up(c_cat + 1, 16)                       # +1 for the ones row

    def prep(p):
        return _nearest_resize_nchw(p.astype(jnp.bfloat16), H3, W3)

    parts = [prep(p3), prep(p4), prep(p5),
             jnp.ones((N, 1, H3, W3), jnp.bfloat16)]
    if c_pad > c_cat + 1:
        parts.append(jnp.zeros((N, c_pad - c_cat - 1, H3, W3), jnp.bfloat16))
    x = jnp.concatenate(parts, axis=1).reshape(N, c_pad, HW)

    folded = fold_params(params, inc, channel, c_pad)
    return x, folded, (N, H3, W3)


def ssff_forward(xs, params, inc, channel, *, tile_lanes=2048,
                 out_dtype=jnp.bfloat16):
    """xs: (p3, p4, p5) in NCHW. Returns NCHW (N, channel, H3, W3)."""
    x, folded, (N, H3, W3) = prepare_inputs(xs, params, inc, channel)
    out = ssff_pallas(x, *folded, channel=channel,
                      tile_lanes=tile_lanes, out_dtype=out_dtype)
    return out.reshape(N, channel, H3, W3)                 # free reshape


# ------------------------- Parameters (deterministic) ----------------------- #

def _fold_bn(gamma, beta, mean, var, eps=1e-5):
    scale = gamma / jnp.sqrt(var + eps)
    return scale, beta - mean * scale


def init_params(key, inc, channel):
    keys = iter(jax.random.split(key, 5 * len(inc) + 6))
    params = []
    for c_in in inc:
        w = 0.2 * jax.random.normal(next(keys), (c_in, channel), jnp.float32)
        gamma = 1.0 + 0.1 * jax.random.normal(next(keys), (channel,), jnp.float32)
        beta = 0.1 * jax.random.normal(next(keys), (channel,), jnp.float32)
        mean = 0.1 * jax.random.normal(next(keys), (channel,), jnp.float32)
        var = 0.5 + jax.nn.softplus(jax.random.normal(next(keys), (channel,), jnp.float32))
        s, b = _fold_bn(gamma, beta, mean, var)
        params += [w, s, b]
    w3 = 0.2 * jax.random.normal(next(keys), (channel, channel), jnp.float32)
    b3 = 0.1 * jax.random.normal(next(keys), (channel,), jnp.float32)
    gamma3 = 1.0 + 0.1 * jax.random.normal(next(keys), (channel,), jnp.float32)
    beta3 = 0.1 * jax.random.normal(next(keys), (channel,), jnp.float32)
    mean3 = 0.1 * jax.random.normal(next(keys), (channel,), jnp.float32)
    var3 = 0.5 + jax.nn.softplus(jax.random.normal(next(keys), (channel,), jnp.float32))
    s3, bb3 = _fold_bn(gamma3, beta3, mean3, var3)
    params += [w3, b3, s3, bb3]
    return tuple(params)


# ------------------------------ References ---------------------------------- #

def ssff_reference_f32(xs, params, inc, channel):
    """Module-faithful f32 reference (eval-mode BN)."""
    (w0, s0, b0, w1, s1, b1, w2, s2, b2, w3, b3c, s3, bb3) = params
    p3, p4, p5 = xs
    _, _, H3, W3 = p3.shape

    def branch(p, w, s, b):
        y = jnp.einsum('nchw,cd->ndhw', p, w)
        y = y * s[None, :, None, None] + b[None, :, None, None]
        y = y * jax.nn.sigmoid(y)                           # SiLU
        z = jnp.einsum('ndhw,de->nehw', y, w3) + b3c[None, :, None, None]
        z = z * s3[None, :, None, None] + bb3[None, :, None, None]
        return jnp.maximum(z, 0.1 * z)                      # LeakyReLU(0.1)

    a0 = branch(p3, w0, s0, b0)
    a1 = branch(_nearest_resize_nchw(p4, H3, W3), w1, s1, b1)
    a2 = branch(_nearest_resize_nchw(p5, H3, W3), w2, s2, b2)
    return jnp.maximum(jnp.maximum(a0, a1), a2)             # MaxPool3d((3,1,1))


def ssff_mirror(x, W1, W3, B3, channel):
    """Exact math mirror of the Pallas kernel (same bf16 folded operands)."""
    y = jnp.einsum('oc,nct->not', W1, x, preferred_element_type=jnp.float32)
    y = 0.5 * y * (1.0 + jnp.tanh(0.5 * y))
    z = jnp.einsum('od,ndt->not', W3, y.astype(W3.dtype),
                   preferred_element_type=jnp.float32) + B3[None]
    z = jnp.maximum(z, 0.1 * z)
    c = channel
    return jnp.maximum(jnp.maximum(z[:, 0:c], z[:, c:2 * c]), z[:, 2 * c:3 * c])


# --------------------------------- Main ------------------------------------- #

if __name__ == "__main__":
    inc = (8, 16, 32)
    channel = 16
    N, H3, W3 = 2, 16, 16

    key = jax.random.PRNGKey(0)
    k3, k4, k5 = jax.random.split(key, 3)
    p3 = jax.random.normal(k3, (N, inc[0], H3, W3), jnp.float32)
    p4 = jax.random.normal(k4, (N, inc[1], H3 // 2, W3 // 2), jnp.float32)
    p5 = jax.random.normal(k5, (N, inc[2], H3 // 4, W3 // 4), jnp.float32)
    xs = (p3, p4, p5)

    params = init_params(jax.random.PRNGKey(42), inc, channel)

    # Production path: bf16 output (default, halves writeback traffic).
    out = jax.block_until_ready(ssff_forward(xs, params, inc, channel))
    assert out.shape == (N, channel, H3, W3), out.shape
    assert out.dtype == jnp.bfloat16

    # 1) Tight check: f32-output kernel vs exact math mirror (same bf16 folding).
    out_f32 = jax.block_until_ready(
        ssff_forward(xs, params, inc, channel, out_dtype=jnp.float32))
    x, folded, _ = prepare_inputs(xs, params, inc, channel)
    mirror = ssff_mirror(x, *folded, channel=channel).reshape(N, channel, H3, W3)
    assert jnp.allclose(out_f32, mirror, atol=2e-3, rtol=2e-3), \
        float(jnp.max(jnp.abs(out_f32 - mirror)))

    # 2) Semantics check vs full-f32 module-faithful reference
    #    (loose tolerance accounts for bf16 MXU operands and bf16 output).
    ref = ssff_reference_f32(xs, params, inc, channel)
    diff = jnp.abs(out.astype(jnp.float32) - ref)
    assert jnp.allclose(out.astype(jnp.float32), ref, atol=2e-1, rtol=1e-1), \
        float(jnp.max(diff))

    print("KERNEL_OK")
</pallas_src>

<mosaic_0001>
module attributes {stable_mosaic.version = 11 : i64} {
  func.func @_ssff_kernel(%arg0: i32, %arg1: i32, %arg2: memref<1x64x256xbf16, #tpu.memory_space<vmem>>, %arg3: memref<48x64xbf16, #tpu.memory_space<vmem>>, %arg4: memref<48x48xbf16, #tpu.memory_space<vmem>>, %arg5: memref<48x1xf32, #tpu.memory_space<vmem>>, %arg6: memref<1x16x256xbf16, #tpu.memory_space<vmem>>) attributes {dimension_semantics = [#tpu.dimension_semantics<parallel>, #tpu.dimension_semantics<parallel>], iteration_bounds = array<i64: 2, 1>, scalar_prefetch = 0 : i64, scratch_operands = 0 : i64, tpu.core_type = #tpu.core_type<tc>, window_params = [{transform_indices = @transform_0, window_bounds = array<i64: 1, 64, 256>}, {pipeline_mode = #tpu.pipeline_mode<synchronous>, transform_indices = @transform_1, window_bounds = array<i64: 48, 64>}, {pipeline_mode = #tpu.pipeline_mode<synchronous>, transform_indices = @transform_2, window_bounds = array<i64: 48, 48>}, {pipeline_mode = #tpu.pipeline_mode<synchronous>, transform_indices = @transform_3, window_bounds = array<i64: 48, 1>}, {transform_indices = @transform_4, window_bounds = array<i64: 1, 16, 256>}]} {
    %c0 = arith.constant 0 : index
    %c0_0 = arith.constant 0 : index
    %c0_1 = arith.constant 0 : index
    %0 = vector.load %arg2[%c0, %c0_0, %c0_1] : memref<1x64x256xbf16, #tpu.memory_space<vmem>>, vector<1x64x256xbf16>
    %1 = vector.shape_cast %0 : vector<1x64x256xbf16> to vector<64x256xbf16>
    %c0_2 = arith.constant 0 : index
    %c0_3 = arith.constant 0 : index
    %2 = vector.load %arg3[%c0_2, %c0_3] : memref<48x64xbf16, #tpu.memory_space<vmem>>, vector<48x64xbf16>
    %cst = arith.constant dense<0.000000e+00> : vector<48x256xf32>
    %3 = tpu.matmul %2, %1, %cst {dimension_numbers = #tpu.dot_dimension_numbers<[1], [0], [0], [1], [0, 0, 1, 1], [], []>} : vector<48x64xbf16>, vector<64x256xbf16>, vector<48x256xf32> -> vector<48x256xf32>
    %cst_4 = arith.constant 5.000000e-01 : f32
    %4 = vector.broadcast %cst_4 : f32 to vector<48x256xf32>
    %5 = arith.mulf %4, %3 : vector<48x256xf32>
    %cst_5 = arith.constant 5.000000e-01 : f32
    %6 = vector.broadcast %cst_5 : f32 to vector<48x256xf32>
    %7 = arith.mulf %6, %3 : vector<48x256xf32>
    %8 = math.tanh %7 : vector<48x256xf32>
    %cst_6 = arith.constant 1.000000e+00 : f32
    %9 = vector.broadcast %cst_6 : f32 to vector<48x256xf32>
    %10 = arith.addf %9, %8 : vector<48x256xf32>
    %11 = arith.mulf %5, %10 : vector<48x256xf32>
    %c0_7 = arith.constant 0 : index
    %c0_8 = arith.constant 0 : index
    %12 = vector.load %arg4[%c0_7, %c0_8] : memref<48x48xbf16, #tpu.memory_space<vmem>>, vector<48x48xbf16>
    %13 = arith.truncf %11 : vector<48x256xf32> to vector<48x256xbf16>
    %cst_9 = arith.constant dense<0.000000e+00> : vector<48x256xf32>
    %14 = tpu.matmul %12, %13, %cst_9 {dimension_numbers = #tpu.dot_dimension_numbers<[1], [0], [0], [1], [0, 0, 1, 1], [], []>} : vector<48x48xbf16>, vector<48x256xbf16>, vector<48x256xf32> -> vector<48x256xf32>
    %c0_10 = arith.constant 0 : index
    %c0_11 = arith.constant 0 : index
    %15 = vector.load %arg5[%c0_10, %c0_11] : memref<48x1xf32, #tpu.memory_space<vmem>>, vector<48x1xf32>
    %16 = vector.broadcast %15 : vector<48x1xf32> to vector<48x256xf32>
    %17 = arith.addf %14, %16 : vector<48x256xf32>
    %cst_12 = arith.constant 1.000000e-01 : f32
    %18 = vector.broadcast %cst_12 : f32 to vector<48x256xf32>
    %19 = arith.mulf %18, %17 : vector<48x256xf32>
    %20 = arith.maximumf %17, %19 : vector<48x256xf32>
    %21 = vector.extract_strided_slice %20 {offsets = [0, 0], sizes = [16, 256], strides = [1, 1]} : vector<48x256xf32> to vector<16x256xf32>
    %22 = vector.extract_strided_slice %20 {offsets = [16, 0], sizes = [16, 256], strides = [1, 1]} : vector<48x256xf32> to vector<16x256xf32>
    %23 = arith.maximumf %21, %22 : vector<16x256xf32>
    %24 = vector.extract_strided_slice %20 {offsets = [32, 0], sizes = [16, 256], strides = [1, 1]} : vector<48x256xf32> to vector<16x256xf32>
    %25 = arith.maximumf %23, %24 : vector<16x256xf32>
    %26 = arith.truncf %25 : vector<16x256xf32> to vector<16x256xbf16>
    %c0_13 = arith.constant 0 : index
    %c0_14 = arith.constant 0 : index
    %c0_15 = arith.constant 0 : index
    %27 = vector.load %arg6[%c0_13, %c0_14, %c0_15] : memref<1x16x256xbf16, #tpu.memory_space<vmem>>, vector<1x16x256xbf16>
    %28 = vector.shape_cast %27 : vector<1x16x256xbf16> to vector<16x256xbf16>
    %29 = vector.shape_cast %26 : vector<16x256xbf16> to vector<1x16x256xbf16>
    tpu.vector_store %arg6[%c0_13, %c0_14, %c0_15], %29 {strides = array<i32>} : memref<1x16x256xbf16, #tpu.memory_space<vmem>>, vector<1x16x256xbf16>,
    return
  }
  func.func @transform_0(%arg0: i32, %arg1: i32) -> (i32, i32, i32) {
    %c0_i32 = arith.constant 0 : i32
    %c0_i32_0 = arith.constant 0 : i32
    return %arg0, %c0_i32, %arg1 : i32, i32, i32
  }
  func.func @transform_1(%arg0: i32, %arg1: i32) -> (i32, i32) {
    %c0_i32 = arith.constant 0 : i32
    %c0_i32_0 = arith.constant 0 : i32
    %c0_i32_1 = arith.constant 0 : i32
    return %c0_i32, %c0_i32_0 : i32, i32
  }
  func.func @transform_2(%arg0: i32, %arg1: i32) -> (i32, i32) {
    %c0_i32 = arith.constant 0 : i32
    %c0_i32_0 = arith.constant 0 : i32
    %c0_i32_1 = arith.constant 0 : i32
    return %c0_i32, %c0_i32_0 : i32, i32
  }
  func.func @transform_3(%arg0: i32, %arg1: i32) -> (i32, i32) {
    %c0_i32 = arith.constant 0 : i32
    %c0_i32_0 = arith.constant 0 : i32
    %c0_i32_1 = arith.constant 0 : i32
    return %c0_i32, %c0_i32_0 : i32, i32
  }
  func.func @transform_4(%arg0: i32, %arg1: i32) -> (i32, i32, i32) {
    %c0_i32 = arith.constant 0 : i32
    %c0_i32_0 = arith.constant 0 : i32
    return %arg0, %c0_i32, %arg1 : i32, i32, i32
  }
}

</mosaic_0001>

<bundles_post_ra>
// kernel: tpu_custom_call.1
= control target key start
LH: loop header
LB: loop body
LE: loop exit
PB: predicated region body
PF: predicated region fallthrough
CT: control target
= control target key end

     0   :  { %9 = vsyncpa [#allocation3], 0  ;;  %s1197_s0 = inlined_call_operand.hbm [shape: bf16[2,64,256], index: 0, kind: input, shape index: {}]   ;;  %s1198_s1 = inlined_call_operand.vmem [shape: bf16[48,64], index: 1, kind: input, shape index: {}]   ;;  %s1199_s2 = inlined_call_operand.vmem [shape: bf16[48,48], index: 2, kind: input, shape index: {}]   ;;  %s1200_s3 = inlined_call_operand.vmem [shape: f32[48,1], index: 3, kind: input, shape index: {}]   ;;  %s1201_s4 = inlined_call_operand.hbm [shape: bf16[2,16,256], index: 4, kind: output, shape index: {}]  }
   0x1   :  { %11 = vsyncpa [#allocation3 + $0x1], 0 }
   0x2   :  { %12 = vsyncpa [#allocation4], 0 }
   0x3   :  { %14 = vsyncpa [#allocation4 + $0x1], 0  ;;  %s1006_s15 = smov 0   ;;  %s1008_s16 = smov 0  }
   0x4   :  { %s1010_s17 = smov 0   ;;  %s1012_s18 = smov 0  }
   0x5   :  { %s1014_s19 = smov 0   ;;  %s1016_s20 = smov 0  }
   0x6 LB: > { %s712_s21 = sadd.s32 4294967295, %s972_s20   ;;  %s713_s22 = sadd.s32 4294967294, %s972_s20   ;;  %s972_s20 = sphi %s1016_s20, %s20_s20   ;;  %s968_s19 = sphi %s1014_s19, %s1212_s19   ;;  %s964_s18 = sphi %s1012_s18, %s1211_s18   ;;  %s960_s17 = sphi %s1010_s17, %s1210_s17   ;;  %s956_s16 = sphi %s1008_s16, %s1209_s16   ;;  %s952_s15 = sphi %s1006_s15, %s1208_s15  }
   0x7   : > { %s32_s23 = sadd.s32 1, %s968_s19  ;;  %s41_s24 = sadd.s32 1, %s960_s17 }
   0x8   : > { %p34_p0 = scmp.ge.s32.totalorder %s32_s23, 2  ;;  %p48_p1 = scmp.ne.s32.totalorder %s960_s17, %s956_s16 }
   0x9   : > { %p49_p2 = scmp.eq.s32.totalorder %s972_s20, 0  ;;  %p54_p3 = scmp.ne.s32.totalorder %s956_s16, %s952_s15 }
   0xa   : > { %s1214_s23 = smov (%p34_p0, %s32_s23), 0  ;;  %p55_p5 = scmp.eq.s32.totalorder %s712_s21, 0 }
   0xb   : > { %p1047_p4 = por %p49_p2, %p48_p1  ;;  %s36_s26 = ssub.s32 %s968_s19, %s1214_s23 }
   0xc   : > { %p143_p6 = scmp.eq.s32.totalorder %s712_s21, 1  ;;  %p39_p7 = scmp.eq.s32.totalorder %s36_s26, 0 }
   0xd   : > { %p1053_p8 = por %p55_p5, %p54_p3  ;;  %p149_p10 = scmp.eq.s32.totalorder %s713_s22, 1 }
   0xe   : > { %p1057_p9 = por %p143_p6, %p48_p1  ;;  %p765_p13 = scmp.lt.s32.totalorder %s972_s20, 2 }
   0xf   : > { %s1062_s29 = scalar_select %p39_p7, %s960_s17, %s41_s24  }
  0x10   : > { %p1064_p11 = por %p149_p10, %p54_p3  ;;  %s178_s5 = sand.u32 1, %s960_s17  }
  0x11   : > { %s716_s6 = sshll.u32 %s178_s5, 6  ;;  %s749_s7 = sshll.u32 %s968_s19, 10 }
  0x12   : > { %s190_s10 = scalar_lea.hbm %s1197_s0, %s749_s7  ;;  %s182_s11 = scalar_lea.vmem [#allocation2], %s716_s6 }
  0x13   : > { %s191_s12 = sshll.u32 %s182_s11, 4  ;;  %p1077_p0 = pnand %p765_p13, %p1047_p4  ;;  %s192_s12 = int_to_ptr.vmem [resolvable:$true] %s191_s12 }
  0x14   : > { %p719_p1 = scmp.ge.s32.totalorder %s972_s20, 1  ;;  %s179_s14 = scalar_lea.sflag [#allocation3], %s178_s5 }
  0x15   : > { %p866_p2 = pneg %p1077_p0  ;;  %s877_s21 = scalar_lea.vmem %s192_s12, 1024 }
  0x16   : > { %p878_p3 = scmp.ne.s32.totalorder %s192_s12, %s877_s21  ;;  %s974_s22 = smov [#allocation2]  }
  0x17   : > { %s882_s24 = sshll.u32 %s974_s22, 4  ;;  %s883_s24 = int_to_ptr.vmem [resolvable:$false] %s882_s24 }
  0x18   : > { %p880_p5 = pnand %p878_p3, %p866_p2  ;;  %s884_s26 = scalar_lea.vmem %s883_s24, 2048 }
  0x19   : > { %p885_p7 = scmp.lt.s32.totalorder %s192_s12, %s883_s24  ;;  %p886_p10 = scmp.lt.s32.totalorder %s884_s26, %s877_s21 }
  0x1a   : > { %p881_p6 = pneg %p880_p5 }
  0x1b   : > { %p887_p12 = por %p886_p10, %p885_p7 }
  0x1d   : > { %p888_p4 = pnand %p887_p12, %p881_p6 }
  0x1f   : > { %891 = shalt.err (!%p888_p4)
}
  0x20   : > { %s975_s25 = smov 128   ;;  %s976_s5 = smov 8  }
  0x21   : > { %760 = dma.hbm_to_vmem [thread:$0]  (!%p1077_p0), %s190_s10, 1024, %s192_s12, %s179_s14, %s975_s25, %s975_s25, %s976_s5  }
  0x22   : > { %p199_p13 = scmp.lt.s32.totalorder %s972_s20, 3 }
  0x24   : > { %p200_p2 = pnand %p719_p1, %p199_p13 }
  0x25   : > { %s1090_s6 = sand.u32 (!%p200_p2), 1, %s956_s16  }
  0x26   : > { %203 = sbr.rel (%p200_p2) target bundleno = 551 (0x227), region = 36  ;;  %s720_s7 = sshll.u32 (!%p200_p2), %s1090_s6, 6 }
  0x27   : > { %s206_s8 = scalar_lea.sflag (!%p200_p2), [#allocation3], %s1090_s6  ;;  %s209_s9 = scalar_lea.vmem (!%p200_p2), [#allocation2], %s720_s7 }
  0x2b   : > { %943 = dma.done.wait (%p1053_p8), %s206_s8, 1024  }
  0x2c   : > { %945 = vsyncadd (%p1053_p8), %s206_s8, 4294966272  ;;  %v977_v0 = vmov 0   ;;  %v822_v1 = vld [vmem:[%s209_s9 + $0x34] ss:$8 sps:$4 sm:$0xff]   ;;  %v824_v2 = vld [vmem:[%s209_s9 + $0x30] ss:$8 sps:$4 sm:$0xff]  }
  0x2d   : > { %348 = vmatprep.mubr.bf16.mxu0 %v977_v0  ;;  %532 = vmatprep.mubr.bf16.mxu1 %v977_v0  ;;  %v825_v3 = vld [vmem:[%s209_s9 + $0x24] ss:$8 sps:$4 sm:$0xff]   ;;  %v827_v4 = vld [vmem:[%s209_s9 + $0x20] ss:$8 sps:$4 sm:$0xff]   ;;  %v828_v5 = vld [vmem:[%s209_s9 + $0x14] ss:$8 sps:$4 sm:$0xff]  }
  0x2e   : > { %820 = vset.pattern.permute.xlu0 %v977_v0  ;;  %821 = vset.pattern.permute.xlu1 %v977_v0  ;;  %v830_v6 = vld [vmem:[%s209_s9 + $0x10] ss:$8 sps:$4 sm:$0xff]   ;;  %v831_v7 = vld [vmem:[%s209_s9 + $0x4] ss:$8 sps:$4 sm:$0xff]   ;;  %v833_v8 = vld [vmem:[%s209_s9] ss:$8 sps:$4 sm:$0xff]  }
  0x2f   : > { %324 = vmatprep.subr.bf16.mxu0 %v822_v1  ;;  %v834_v9 = vld [vmem:[%s1198_s1] sm:$0xff]   ;;  %vm306_vm0 = vcmask 523264   ;;  %v835_v10 = vld [vmem:[%s1198_s1 + $0x8] sm:$0xff]   ;;  %v836_v11 = vld [vmem:[%s1198_s1 + $0x10] sm:$0xff]   ;;  %vm490_vm1 = vcmask 392192   ;;  %s721_s26 = sshll.u32 %s1090_s6, 4 }
  0x30   : > { %325 = vmatpush1.bf16.msra.mxu0 %v824_v2  ;;  %v439_v12 = vld [vmem:[%s1200_s3] sm:$0xff]  ;;  %v441_v13 = vld [vmem:[%s1200_s3 + $0x10] sm:$0xff]  ;;  %v440_v14 = vld [vmem:[%s1200_s3 + $0x8] sm:$0xff]  ;;  %s233_s25 = scalar_lea.vmem [#allocation5], %s721_s26  ;;  %s752_s7 = sshll.u32 %s964_s18, 8 }
  0x31   : > { %326 = vmatprep.subr.bf16.mxu0 %v825_v3  ;;  %447 = vperm.xlu0 %820, %v439_v12   ;;  %v442_v15 = vld [vmem:[%s1200_s3 + $0x18] sm:$0xff]  ;;  %v444_v16 = vld [vmem:[%s1200_s3 + $0x28] sm:$0xff]  ;;  %v443_v17 = vld [vmem:[%s1200_s3 + $0x20] sm:$0xff]  ;;  %s625_s5 = sshll.u32 %s233_s25, 4  ;;  %s1147_s27 = scalar_lea.hbm %s1201_s4, %s752_s7  ;;  %s1149_s5 = int_to_ptr.vmem [resolvable:$true] %s625_s5 }
  0x32   : > { %457 = vperm.xlu1 %821, %v441_v13   ;;  %s610_s10 = scalar_lea.sflag [#allocation4], %s1090_s6  ;;  %s892_s11 = scalar_lea.vmem %s1149_s5, 256 }
  0x33   : > { %p893_p8 = scmp.ne.s32.totalorder %s1149_s5, %s892_s11  ;;  %s978_s18 = smov [#allocation5]  }
  0x34   : > { %327 = vmatpush1.bf16.msra.mxu0 %v827_v4  ;;  %s896_s12 = sshll.u32 %s978_s18, 4  ;;  %s897_s12 = int_to_ptr.vmem [resolvable:$false] %s896_s12 }
  0x35   : > { %328 = vmatprep.subr.bf16.mxu0 %v828_v5  ;;  %452 = vperm.xlu0 %820, %v440_v14   ;;  %p894_p12 = pnand %p893_p8, %p1057_p9  ;;  %s898_s13 = scalar_lea.vmem %s897_s12, 512 }
  0x36   : > { %462 = vperm.xlu1 %821, %v442_v15   ;;  %p899_p1 = scmp.lt.s32.totalorder %s1149_s5, %s897_s12  ;;  %p900_p3 = scmp.lt.s32.totalorder %s898_s13, %s892_s11 }
  0x37   : > { %p895_p0 = pneg %p894_p12 }
  0x38   : > { %329 = vmatpush1.bf16.msra.mxu0 %v830_v6  ;;  %p901_p5 = por %p900_p3, %p899_p1 }
  0x39   : > { %330 = vmatprep.subr.bf16.mxu0 %v831_v7  ;;  %467 = vperm.xlu0 %820, %v443_v17  }
  0x3a   : > { %472 = vperm.xlu1 %821, %v444_v16   ;;  %p902_p6 = pnand %p901_p5, %p895_p0 }
  0x3c   : > { %331 = vmatpush1.bf16.msra.mxu0 %v833_v8 }
  0x3f   : > { %733 = vmatmul.mubr.msk.bf16.vlgmr.msra.gmra.mxu0 %vm306_vm0, %v834_v9 }
  0x40   : > { %358 = vmatprep.mubr.bf16.mxu0 %v977_v0 }
  0x47   : > { %734 = vmatmul.mubr.msk.bf16.gmra.mxu0 %vm306_vm0, %v835_v10 }
  0x48   : > { %368 = vmatprep.mubr.bf16.mxu0 %v977_v0 }
  0x4f   : > { %735 = vmatmul.mubr.msk.bf16.gmra.mxu0 %vm306_vm0, %v836_v11 }
  0xff   : > { %v350_v18 = vpop.f32.mrf.mxu0 }
 0x100   : > { %v379_v41 = vmul.f32 0.5, %v350_v18 }
 0x101   : > { %v352_v19 = vpop.f32.mrf.mxu0 }
 0x102   : > { %v380_v38 = vmul.f32 0.5, %v352_v19 }
 0x103   : > { %v354_v20 = vpop.f32.mrf.mxu0 }
 0x104   : > { %v381_v40 = vmul.f32 0.5, %v354_v20 }
 0x105   : > { %v356_v21 = vpop.f32.mrf.mxu0 }
 0x106   : > { %v382_v25 = vmul.f32 0.5, %v356_v21  ;;  %v837_v21 = vld [vmem:[%s1199_s2] sm:$0xff]  }
 0x107   : > { %v360_v22 = vpop.f32.mrf.mxu0 }
 0x108   : > { %840 = vtanh.f32 %v382_v25  ;;  %v383_v36 = vmul.f32 0.5, %v360_v22  ;;  %v838_v22 = vld [vmem:[%s1199_s2 + $0x8] sm:$0xff]  }
 0x109   : > { %v362_v23 = vpop.f32.mrf.mxu0 }
 0x10a   : > { %v384_v27 = vmul.f32 0.5, %v362_v23  ;;  %v839_v23 = vld [vmem:[%s1199_s2 + $0x10] sm:$0xff]  }
 0x10b   : > { %v364_v24 = vpop.f32.mrf.mxu0 }
 0x10c   : > { %842 = vtanh.f32 %v384_v27  ;;  %v385_v33 = vmul.f32 0.5, %v364_v24 }
 0x10d   : > { %v366_v26 = vpop.f32.mrf.mxu0 }
 0x10e   : > { %v386_v28 = vmul.f32 0.5, %v366_v26 }
 0x10f   : > { %v370_v29 = vpop.f32.mrf.mxu0 }
 0x110   : > { %v387_v30 = vmul.f32 0.5, %v370_v29  ;;  %844 = vtanh.f32 %v386_v28  ;;  %v458_v29 = vpop.permute.xlu1 %457 }
 0x111   : > { %v372_v31 = vpop.f32.mrf.mxu0 }
 0x112   : > { %v388_v32 = vmul.f32 0.5, %v372_v31 }
 0x113   : > { %v374_v34 = vpop.f32.mrf.mxu0 }
 0x114   : > { %846 = vtanh.f32 %v388_v32  ;;  %v389_v35 = vmul.f32 0.5, %v374_v34 }
 0x115   : > { %848 = vtanh.f32 %v387_v30  ;;  %v376_v37 = vpop.f32.mrf.mxu0  ;;  %v841_v42 = vpop.eup %840 }
 0x116   : > { %850 = vtanh.f32 %v389_v35  ;;  %v390_v39 = vmul.f32 0.5, %v376_v37  ;;  %v406_v61 = vadd.f32 1.0, %v841_v42 }
 0x117   : > { %852 = vtanh.f32 %v385_v33 }
 0x118   : > { %854 = vtanh.f32 %v390_v39  ;;  %v418_v11 = vmul.f32 %v406_v61, %v382_v25 }
 0x119   : > { %856 = vtanh.f32 %v383_v36  ;;  %v843_v43 = vpop.eup %842 }
 0x11a   : > { %858 = vtanh.f32 %v380_v38  ;;  %v408_v55 = vadd.f32 1.0, %v843_v43 }
 0x11b   : > { %860 = vtanh.f32 %v381_v40 }
 0x11c   : > { %862 = vtanh.f32 %v379_v41  ;;  %v420_v6 = vmul.f32 %v408_v55, %v384_v27  ;;  %v448_v27 = vpop.permute.xlu0 %447 }
 0x11d   : > { %v845_v44 = vpop.eup %844 }
 0x11e   : > { %v410_v49 = vadd.f32 1.0, %v845_v44 }
 0x120   : > { %v422_v62 = vmul.f32 %v410_v49, %v386_v28 }
 0x121   : > { %v847_v45 = vpop.eup %846 }
 0x122   : > { %v849_v46 = vpop.eup %848  ;;  %v412_v51 = vadd.f32 1.0, %v847_v45  ;;  %v436_v12 = vpack.c.bf16 %v422_v62, %v420_v6 }
 0x123   : > { %v851_v47 = vpop.eup %850  ;;  %v411_v53 = vadd.f32 1.0, %v849_v46 }
 0x124   : > { %v853_v48 = vpop.eup %852  ;;  %v413_v50 = vadd.f32 1.0, %v851_v47  ;;  %v424_v1 = vmul.f32 %v412_v51, %v388_v32 }
 0x125   : > { %v855_v52 = vpop.eup %854  ;;  %v409_v58 = vadd.f32 1.0, %v853_v48  ;;  %v423_v3 = vmul.f32 %v411_v53, %v387_v30 }
 0x126   : > { %v857_v54 = vpop.eup %856  ;;  %v414_v56 = vadd.f32 1.0, %v855_v52  ;;  %v425_v59 = vmul.f32 %v413_v50, %v389_v35 }
 0x127   : > { %v859_v57 = vpop.eup %858  ;;  %v407_v2 = vadd.f32 1.0, %v857_v54  ;;  %v421_v9 = vmul.f32 %v409_v58, %v385_v33 }
 0x128   : > { %v861_v60 = vpop.eup %860  ;;  %v426_v63 = vmul.f32 %v414_v56, %v390_v39  ;;  %v404_v5 = vadd.f32 1.0, %v859_v57  ;;  %v437_v10 = vpack.c.bf16 %v425_v59, %v423_v3 }
 0x129   : > { %v863_v4 = vpop.eup %862  ;;  %v405_v8 = vadd.f32 1.0, %v861_v60  ;;  %v419_v14 = vmul.f32 %v407_v2, %v383_v36  ;;  %v453_v36 = vpop.permute.xlu0 %452 }
 0x12a   : > { %v438_v7 = vpack.c.bf16 %v426_v63, %v424_v1  ;;  %v403_v13 = vadd.f32 1.0, %v863_v4  ;;  %v416_v15 = vmul.f32 %v404_v5, %v380_v38 }
 0x12b   : > { %v417_v16 = vmul.f32 %v405_v8, %v381_v40  ;;  %v435_v17 = vpack.c.bf16 %v421_v9, %v419_v14 }
 0x12c   : > { %510 = vmatprep.subr.bf16.mxu1 %v438_v7  ;;  %v434_v18 = vpack.c.bf16 %v418_v11, %v416_v15  ;;  %v415_v19 = vmul.f32 %v403_v13, %v379_v41 }
 0x12d   : > { %511 = vmatpush1.bf16.msra.mxu1 %v437_v10  ;;  %v468_v47 = vpop.permute.xlu0 %467 }
 0x12e   : > { %512 = vmatprep.subr.bf16.mxu1 %v436_v12  ;;  %v433_v20 = vpack.c.bf16 %v417_v16, %v415_v19 }
 0x131   : > { %513 = vmatpush1.bf16.msra.mxu1 %v435_v17 }
 0x132   : > { %514 = vmatprep.subr.bf16.mxu1 %v434_v18 }
 0x135   : > { %515 = vmatpush1.bf16.msra.mxu1 %v433_v20 }
 0x138   : > { %739 = vmatmul.mubr.msk.bf16.vlgmr.msra.gmra.mxu1 %vm490_vm1, %v837_v21 }
 0x139   : > { %542 = vmatprep.mubr.bf16.mxu1 %v977_v0 }
 0x140   : > { %740 = vmatmul.mubr.msk.bf16.gmra.mxu1 %vm490_vm1, %v838_v22 }
 0x141   : > { %552 = vmatprep.mubr.bf16.mxu1 %v977_v0  ;;  %v463_v0 = vpop.permute.xlu1 %462 }
 0x145   : > { %v473_v61 = vpop.permute.xlu1 %472 }
 0x148   : > { %741 = vmatmul.mubr.msk.bf16.gmra.mxu1 %vm490_vm1, %v839_v23 }
 0x1f8   : > { %v534_v24 = vpop.f32.mrf.mxu1 }
 0x1f9   : > { %v535_v34 = vadd.f32 %v534_v24, %v448_v27 }
 0x1fa   : > { %v536_v25 = vpop.f32.mrf.mxu1 }
 0x1fb   : > { %v537_v35 = vadd.f32 %v536_v25, %v448_v27  ;;  %v563_v43 = vmul.f32 0.1, %v535_v34 }
 0x1fc   : > { %v538_v26 = vpop.f32.mrf.mxu1 }
 0x1fd   : > { %v564_v44 = vmul.f32 0.1, %v537_v35  ;;  %v539_v45 = vadd.f32 %v538_v26, %v453_v36  ;;  %v575_v57 = vmax.f32 %v535_v34, %v563_v43 }
 0x1fe   : > { %v540_v28 = vpop.f32.mrf.mxu1 }
 0x1ff   : > { %v541_v46 = vadd.f32 %v540_v28, %v453_v36  ;;  %v576_v58 = vmax.f32 %v537_v35, %v564_v44  ;;  %v565_v59 = vmul.f32 0.1, %v539_v45 }
 0x200   : > { %v544_v30 = vpop.f32.mrf.mxu1 }
 0x201   : > { %v545_v31 = vadd.f32 %v544_v30, %v458_v29  ;;  %v566_v60 = vmul.f32 0.1, %v541_v46  ;;  %v577_v11 = vmax.f32 %v539_v45, %v565_v59 }
 0x202   : > { %v546_v32 = vpop.f32.mrf.mxu1 }
 0x203   : > { %v547_v33 = vadd.f32 %v546_v32, %v458_v29  ;;  %v567_v38 = vmul.f32 0.1, %v545_v31  ;;  %v578_v12 = vmax.f32 %v541_v46, %v566_v60 }
 0x204   : > { %v548_v37 = vpop.f32.mrf.mxu1 }
 0x205   : > { %v568_v39 = vmul.f32 0.1, %v547_v33  ;;  %v549_v40 = vadd.f32 %v548_v37, %v463_v0  ;;  %v579_v50 = vmax.f32 %v545_v31, %v567_v38 }
 0x206   : > { %v550_v41 = vpop.f32.mrf.mxu1 }
 0x207   : > { %v551_v42 = vadd.f32 %v550_v41, %v463_v0  ;;  %v580_v51 = vmax.f32 %v547_v33, %v568_v39  ;;  %v569_v52 = vmul.f32 0.1, %v549_v40  ;;  %v587_v3 = vmax.f32 %v575_v57, %v579_v50 }
 0x208   : > { %v554_v48 = vpop.f32.mrf.mxu1 }
 0x209   : > { %v555_v49 = vadd.f32 %v554_v48, %v468_v47  ;;  %v570_v54 = vmul.f32 0.1, %v551_v42  ;;  %v588_v4 = vmax.f32 %v576_v58, %v580_v51  ;;  %v581_v5 = vmax.f32 %v549_v40, %v569_v52 }
 0x20a   : > { %v556_v53 = vpop.f32.mrf.mxu1 }
 0x20b   : > { %v571_v55 = vmul.f32 0.1, %v555_v49  ;;  %v557_v56 = vadd.f32 %v556_v53, %v468_v47  ;;  %v582_v7 = vmax.f32 %v551_v42, %v570_v54  ;;  %v589_v17 = vmax.f32 %v577_v11, %v581_v5 }
 0x20c   : > { %v558_v62 = vpop.f32.mrf.mxu1 }
 0x20d   : > { %v583_v63 = vmax.f32 %v555_v49, %v571_v55  ;;  %v572_v1 = vmul.f32 0.1, %v557_v56  ;;  %v559_v2 = vadd.f32 %v558_v62, %v473_v61  ;;  %v590_v18 = vmax.f32 %v578_v12, %v582_v7 }
 0x20e   : > { %v560_v6 = vpop.f32.mrf.mxu1 }
 0x20f   : > { %v584_v8 = vmax.f32 %v557_v56, %v572_v1  ;;  %v573_v9 = vmul.f32 0.1, %v559_v2  ;;  %v561_v10 = vadd.f32 %v560_v6, %v473_v61  ;;  %v591_v13 = vmax.f32 %v587_v3, %v583_v63 }
 0x211   : > { %v592_v14 = vmax.f32 %v588_v4, %v584_v8  ;;  %v585_v15 = vmax.f32 %v559_v2, %v573_v9  ;;  %v574_v16 = vmul.f32 0.1, %v561_v10 }
 0x213   : > { %v750_v19 = vpack.c.bf16 %v592_v14, %v591_v13  ;;  %v586_v20 = vmax.f32 %v561_v10, %v574_v16  ;;  %v593_v21 = vmax.f32 %v589_v17, %v585_v15 }
 0x215   : > { %607 = vst [vmem:[%s233_s25] sm:$0xff] %v750_v19  ;;  %v594_v22 = vmax.f32 %v590_v18, %v586_v20 }
 0x217   : > { %v751_v23 = vpack.c.bf16 %v594_v22, %v593_v21 }
 0x219   : > { %608 = vst [vmem:[%s233_s25 + $0x8] sm:$0xff] %v751_v23 }
 0x21a   : > { %905 = shalt.err (!%p902_p6)
}
 0x21b   : > { %s906_s14 = scalar_lea.hbm %s1147_s27, 256  ;;  %s910_s24 = scalar_lea.hbm %s1201_s4, 512 }
 0x21c   : > { %p907_p7 = scmp.ne.s32.totalorder %s1147_s27, %s906_s14  ;;  %p911_p13 = scmp.lt.s32.totalorder %s1147_s27, %s1201_s4 }
 0x21d   : > { %p912_p2 = scmp.lt.s32.totalorder %s910_s24, %s906_s14 }
 0x21e   : > { %p908_p10 = pnand %p907_p7, %p1057_p9 }
 0x21f   : > { %p913_p8 = por %p912_p2, %p911_p13 }
 0x220   : > { %p909_p4 = pneg %p908_p10 }
 0x222   : > { %p914_p12 = pnand %p913_p8, %p909_p4 }
 0x224   : > { %917 = shalt.err (!%p914_p12)
}
 0x225   : > { %s979_s7 = smov 128   ;;  %s980_s8 = smov 8  }
 0x226   : > { %755 = dma.vmem_to_hbm [thread:$0]  (%p1057_p9), %s1149_s5, 256, %s1147_s27, %s610_s10, %s979_s7, %s979_s7, %s980_s8  }
 0x227 PF: > { %s640_s9 = sand.u32 1, %s952_s15   ;;  %p1207_p0 = scmp.ge.s32.totalorder %s972_s20, 2 }
 0x228   : > { %s641_s11 = scalar_lea.sflag [#allocation4], %s640_s9 }
 0x229   : > { %p762_p1 = pnand %p1207_p0, %p1064_p11 }
 0x22b   : > { %p763_p3 = pneg %p762_p1 }
 0x22d   : > { %947 = dma.done.wait (%p763_p3), %s641_s11, 256  }
 0x22e   : > { %949 = vsyncadd (%p763_p3), %s641_s11, 4294967040  ;;  %s20_s20 = sadd.s32 1, %s972_s20   ;;  %s1208_s15 = smov %s956_s16 }
 0x22f   : > { %p17_p5 = scmp.ge.s32.totalorder %s20_s20, 4   ;;  %s1209_s16 = smov %s960_s17 }
 0x230   : > { %s1210_s17 = smov %s1062_s29  ;;  %s1211_s18 = smov %s968_s19 }
 0x231   : > { %s1212_s19 = smov %s1214_s23  ;;  %19 = sbr.rel (!%p17_p5) target bundleno = 6 (0x6), region = 81 }
 0x236   :  { %646 = vsyncpa [#allocation3], 1 }
 0x237   :  { %648 = vsyncpa [#allocation3 + $0x1], 1 }
 0x238   :  { %649 = vsyncpa [#allocation4], 1 }
 0x239   :  { %651 = vsyncpa [#allocation4 + $0x1], 1 }

</bundles_post_ra>
